<compile_context>
chip_gen: v5e
topology: v5e:2x2
jax: 0.10.0
libtpu: 0.0.40
codegen_flags: <defaults>
</compile_context>

<pallas_src>
import functools

import jax
import jax.numpy as jnp
from jax.experimental import pallas as pl
from jax.experimental.pallas import tpu as pltpu

_LANES = 128


def _pool_mean_f32(x, HW):
    """Mean over the lane (spatial) axis of a (R, HW) slab -> (R, 1) float32.

    128-wide lane-aligned chunks (cast chunk-by-chunk, up to 4 independent
    accumulator chains) plus one tail chunk; a single lane reduce at the end.
    Never materializes a full-width f32 copy of the slab.
    """
    n_full = HW // _LANES
    tail = HW - n_full * _LANES
    partials = []

    if n_full > 0:
        n_acc = min(4, n_full)
        accs = [
            x[:, i * _LANES:(i + 1) * _LANES].astype(jnp.float32)
            for i in range(n_acc)
        ]
        for i in range(n_acc, n_full):
            a = i % n_acc
            accs[a] = accs[a] + x[:, i * _LANES:(i + 1) * _LANES].astype(jnp.float32)
        total = accs[0]
        for a in accs[1:]:
            total = total + a
        partials.append(jnp.sum(total, axis=-1, keepdims=True))

    if tail > 0:
        partials.append(
            jnp.sum(x[:, n_full * _LANES:].astype(jnp.float32),
                    axis=-1, keepdims=True))

    s = partials[0]
    for p in partials[1:]:
        s = s + p
    return s * (1.0 / HW)


def _se_kernel(x_ref, w1_ref, b1_ref, w2_ref, b2_ref, o_ref,
               pooled_ref, gate_ref, *, n_blk, C, Cr, HW, use_mxu):
    # x / o block: (n_blk*C, HW) -- dense sublanes, lane-major spatial axis.
    x = x_ref[...]                                   # native dtype

    # ---- Squeeze: global average pool over the spatial (lane) axis ----------
    pooled_ref[...] = _pool_mean_f32(x, HW)          # (n_blk*C, 1) f32

    # ---- Excitation MLP (tiny: C x Cr), per sample in the block ------------
    w1m = w1_ref[...]                                # VPU: (C, Cr)==w1.T ; MXU: (Cr, C)
    w2m = w2_ref[...]                                # (C, Cr) untransposed (both paths)
    b1 = b1_ref[...]                                 # VPU: (1, Cr) ; MXU: (Cr, 1)
    b2 = b2_ref[...]                                 # (C, 1)

    for n in range(n_blk):                           # n_blk is small (1 in parallel mode)
        pn = pooled_ref[n * C:(n + 1) * C, :]        # (C, 1) f32
        if use_mxu:
            # Production channel counts: two small matmuls on the MXU instead
            # of a large broadcast-product + sublane reduce.
            h = jnp.dot(w1m, pn, preferred_element_type=jnp.float32) + b1   # (Cr, 1)
            h = jnp.maximum(h, 0.0)
            g = jnp.dot(w2m, h, preferred_element_type=jnp.float32) + b2    # (C, 1)
        else:
            # Tiny channel counts: pure-VPU broadcast products + tiny reduces,
            # no MXU pass, no per-channel unrolling, no sublane concatenates.
            h = jnp.sum(pn * w1m, axis=0, keepdims=True) + b1               # (1, Cr)
            h = jnp.maximum(h, 0.0)
            g = jnp.sum(h * w2m, axis=1, keepdims=True) + b2                # (C, 1)
        # Hardsigmoid
        gate_ref[n * C:(n + 1) * C, :] = jnp.clip(g * (1.0 / 6.0) + 0.5, 0.0, 1.0)

    # ---- Scale: per-(n, c) gate broadcast over spatial lanes, native dtype --
    # (gate cast to x.dtype before the multiply: matches typical mixed-precision
    # behaviour; exact for the f32 test dtype.)
    gate = gate_ref[...].astype(x.dtype)             # (n_blk*C, 1)
    o_ref[...] = (x * gate).astype(o_ref.dtype)


def squeeze_excitation(x, w1, b1, w2, b2, *, alias_input=False):
    """x: (N, C, H, W). w1: (Cr, C), b1: (Cr,), w2: (C, Cr), b2: (C,)."""
    N, C, H, W = x.shape
    HW = H * W
    Cr = w1.shape[0]
    R = N * C
    itemsize = jnp.dtype(x.dtype).itemsize

    # Static path selection.
    use_mxu = (C * Cr) >= 8192          # real MobileNetV3 SE sizes (480x120, 960x240)
    # Use both v7x TensorCores / megacore sharding only when each sample's
    # (C, HW) slab is big enough to amortize per-step overhead and C keeps the
    # sublanes dense; at toy sizes a single-step full-batch slab wins.
    parallel_over_n = (N > 1) and (C % 8 == 0) and (C * HW * itemsize >= (1 << 20))

    if parallel_over_n:
        grid = (N,)
        blk_rows = C
        n_blk = 1
        semantics = ("parallel",)
        xo_map = lambda n: (n, 0)
    else:
        grid = (1,)
        blk_rows = R
        n_blk = N
        semantics = ("arbitrary",)
        xo_map = lambda i: (0, 0)

    x2d = x.reshape(R, HW)              # free for contiguous NCHW

    f32 = jnp.float32
    if use_mxu:
        w1_arg = w1.astype(f32)                       # (Cr, C)
        b1_arg = b1.astype(f32).reshape(Cr, 1)
    else:
        w1_arg = jnp.transpose(w1).astype(f32)        # (C, Cr) == w1.T
        b1_arg = b1.astype(f32).reshape(1, Cr)
    w2_arg = w2.astype(f32)                           # (C, Cr) untransposed
    b2_arg = b2.astype(f32).reshape(C, 1)

    kernel = functools.partial(
        _se_kernel, n_blk=n_blk, C=C, Cr=Cr, HW=HW, use_mxu=use_mxu)

    cost = pl.CostEstimate(
        flops=3 * R * HW + 4 * N * C * Cr,
        transcendentals=0,
        bytes_accessed=2 * R * HW * itemsize + 4 * (2 * C * Cr + C + Cr),
    )

    # VMEM budget: double-buffered x + out slabs plus tiny weights/scratch.
    # Only raise the scoped limit when actually needed (v6e default is 32 MiB;
    # v7x physical VMEM is 64 MiB -- see HW re-tiling TODO in the header).
    slab_bytes = blk_rows * HW * itemsize
    vmem_need = 4 * slab_bytes + (1 << 20)
    compiler_kwargs = dict(dimension_semantics=semantics)
    if vmem_need > (32 << 20):
        compiler_kwargs["vmem_limit_bytes"] = int(min(vmem_need, 96 << 20))

    out = pl.pallas_call(
        kernel,
        out_shape=jax.ShapeDtypeStruct((R, HW), x.dtype),
        grid_spec=pltpu.PrefetchScalarGridSpec(
            num_scalar_prefetch=0,
            grid=grid,
            in_specs=[
                pl.BlockSpec((blk_rows, HW), xo_map),          # x slab
                pl.BlockSpec(w1_arg.shape, lambda i: (0, 0)),  # w1 (layout per path)
                pl.BlockSpec(b1_arg.shape, lambda i: (0, 0)),  # b1
                pl.BlockSpec(w2_arg.shape, lambda i: (0, 0)),  # w2 (untransposed)
                pl.BlockSpec(b2_arg.shape, lambda i: (0, 0)),  # b2
            ],
            out_specs=pl.BlockSpec((blk_rows, HW), xo_map),
            scratch_shapes=[
                pltpu.VMEM((blk_rows, 1), jnp.float32),        # pooled stats
                pltpu.VMEM((blk_rows, 1), jnp.float32),        # per-(n, c) gate
            ],
        ),
        compiler_params=pltpu.CompilerParams(**compiler_kwargs),
        cost_estimate=cost,
        input_output_aliases=({0: 0} if alias_input else {}),
    )(x2d, w1_arg, b1_arg, w2_arg, b2_arg)

    return out.reshape(N, C, H, W)


def _reference(x, w1, b1, w2, b2):
    # Pure-JAX reference (matches the PyTorch SqueezeExcitation forward).
    pooled = jnp.mean(x, axis=(2, 3))                       # (N, C)
    h = jnp.maximum(pooled @ w1.T + b1, 0.0)                # (N, Cr)
    g = h @ w2.T + b2                                       # (N, C)
    g = jnp.clip(g / 6.0 + 0.5, 0.0, 1.0)
    return x * g[:, :, None, None]


def _run_case(key, N, C, H, W):
    Cr = max(1, round(C * 0.25))
    kx, k1, k2, k3, k4 = jax.random.split(key, 5)
    x = jax.random.normal(kx, (N, C, H, W), dtype=jnp.float32)
    w1 = jax.random.normal(k1, (Cr, C), dtype=jnp.float32) * 0.5
    b1 = jax.random.normal(k2, (Cr,), dtype=jnp.float32) * 0.1
    w2 = jax.random.normal(k3, (C, Cr), dtype=jnp.float32) * 0.5
    b2 = jax.random.normal(k4, (C,), dtype=jnp.float32) * 0.1

    out = squeeze_excitation(x, w1, b1, w2, b2)
    out = jax.block_until_ready(out)

    ref = _reference(x, w1, b1, w2, b2)
    assert out.shape == (N, C, H, W)
    assert jnp.allclose(out, ref, atol=1e-5, rtol=1e-5), "mismatch vs reference"


if __name__ == "__main__":
    key = jax.random.PRNGKey(0)
    k_main, k_tail = jax.random.split(key, 2)

    # Primary small shape consistent with the module (NCHW, C=4, 16x16 spatial).
    _run_case(k_main, N=2, C=4, H=16, W=16)

    # Non-128-multiple spatial size (14x14 -> HW=196), exercises the chunk+tail
    # pooling path and Cr=2 in the excitation MLP.
    _run_case(k_tail, N=2, C=8, H=14, W=14)

    print("KERNEL_OK")
</pallas_src>

<mosaic_0001>
module attributes {stable_mosaic.version = 11 : i64} {
  func.func @_se_kernel(%arg0: i32, %arg1: memref<8x256xf32, #tpu.memory_space<vmem>>, %arg2: memref<4x1xf32, #tpu.memory_space<vmem>>, %arg3: memref<1x1xf32, #tpu.memory_space<vmem>>, %arg4: memref<4x1xf32, #tpu.memory_space<vmem>>, %arg5: memref<4x1xf32, #tpu.memory_space<vmem>>, %arg6: memref<8x256xf32, #tpu.memory_space<vmem>>, %arg7: memref<8x1xf32, #tpu.memory_space<vmem>>, %arg8: memref<8x1xf32, #tpu.memory_space<vmem>>) attributes {dimension_semantics = [#tpu.dimension_semantics<arbitrary>], iteration_bounds = array<i64: 1>, scalar_prefetch = 0 : i64, scratch_operands = 2 : i64, tpu.core_type = #tpu.core_type<tc>, window_params = [{pipeline_mode = #tpu.pipeline_mode<synchronous>, transform_indices = @transform_0, window_bounds = array<i64: 8, 256>}, {pipeline_mode = #tpu.pipeline_mode<synchronous>, transform_indices = @transform_1, window_bounds = array<i64: 4, 1>}, {pipeline_mode = #tpu.pipeline_mode<synchronous>, transform_indices = @transform_2, window_bounds = array<i64: 1, 1>}, {pipeline_mode = #tpu.pipeline_mode<synchronous>, transform_indices = @transform_3, window_bounds = array<i64: 4, 1>}, {pipeline_mode = #tpu.pipeline_mode<synchronous>, transform_indices = @transform_4, window_bounds = array<i64: 4, 1>}, {pipeline_mode = #tpu.pipeline_mode<synchronous>, transform_indices = @transform_5, window_bounds = array<i64: 8, 256>}]} {
    %c0 = arith.constant 0 : index
    %c0_0 = arith.constant 0 : index
    %0 = vector.load %arg1[%c0, %c0_0] : memref<8x256xf32, #tpu.memory_space<vmem>>, vector<8x256xf32>
    %1 = vector.extract_strided_slice %0 {offsets = [0, 0], sizes = [8, 128], strides = [1, 1]} : vector<8x256xf32> to vector<8x128xf32>
    %2 = vector.extract_strided_slice %0 {offsets = [0, 128], sizes = [8, 128], strides = [1, 1]} : vector<8x256xf32> to vector<8x128xf32>
    %3 = arith.addf %1, %2 : vector<8x128xf32>
    %cst = arith.constant dense<0.000000e+00> : vector<8xf32>
    %4 = vector.multi_reduction <add>, %3, %cst [1] : vector<8x128xf32> to vector<8xf32>
    %5 = vector.shape_cast %4 : vector<8xf32> to vector<8x1xf32>
    %cst_1 = arith.constant 3.906250e-03 : f32
    %6 = vector.broadcast %cst_1 : f32 to vector<8x1xf32>
    %7 = arith.mulf %5, %6 : vector<8x1xf32>
    %c0_2 = arith.constant 0 : index
    %c0_3 = arith.constant 0 : index
    %8 = vector.load %arg7[%c0_2, %c0_3] : memref<8x1xf32, #tpu.memory_space<vmem>>, vector<8x1xf32>
    tpu.vector_store %arg7[%c0_2, %c0_3], %7 {strides = array<i32>} : memref<8x1xf32, #tpu.memory_space<vmem>>, vector<8x1xf32>,
    %c0_4 = arith.constant 0 : index
    %c0_5 = arith.constant 0 : index
    %9 = vector.load %arg2[%c0_4, %c0_5] : memref<4x1xf32, #tpu.memory_space<vmem>>, vector<4x1xf32>
    %c0_6 = arith.constant 0 : index
    %c0_7 = arith.constant 0 : index
    %10 = vector.load %arg4[%c0_6, %c0_7] : memref<4x1xf32, #tpu.memory_space<vmem>>, vector<4x1xf32>
    %c0_8 = arith.constant 0 : index
    %c0_9 = arith.constant 0 : index
    %11 = vector.load %arg3[%c0_8, %c0_9] : memref<1x1xf32, #tpu.memory_space<vmem>>, vector<1x1xf32>
    %c0_10 = arith.constant 0 : index
    %c0_11 = arith.constant 0 : index
    %12 = vector.load %arg5[%c0_10, %c0_11] : memref<4x1xf32, #tpu.memory_space<vmem>>, vector<4x1xf32>
    %c0_12 = arith.constant 0 : index
    %c0_13 = arith.constant 0 : index
    %13 = vector.load %arg7[%c0_12, %c0_13] : memref<8x1xf32, #tpu.memory_space<vmem>>, vector<4x1xf32>
    %14 = arith.mulf %13, %9 : vector<4x1xf32>
    %cst_14 = arith.constant dense<0.000000e+00> : vector<1xf32>
    %15 = vector.multi_reduction <add>, %14, %cst_14 [0] : vector<4x1xf32> to vector<1xf32>
    %16 = vector.shape_cast %15 : vector<1xf32> to vector<1x1xf32>
    %17 = arith.addf %16, %11 : vector<1x1xf32>
    %cst_15 = arith.constant 0.000000e+00 : f32
    %18 = vector.broadcast %cst_15 : f32 to vector<1x1xf32>
    %19 = arith.maximumf %17, %18 : vector<1x1xf32>
    %20 = vector.broadcast %19 : vector<1x1xf32> to vector<4x1xf32>
    %21 = arith.mulf %20, %10 : vector<4x1xf32>
    %cst_16 = arith.constant dense<0.000000e+00> : vector<4xf32>
    %22 = vector.multi_reduction <add>, %21, %cst_16 [1] : vector<4x1xf32> to vector<4xf32>
    %23 = vector.shape_cast %22 : vector<4xf32> to vector<4x1xf32>
    %24 = arith.addf %23, %12 : vector<4x1xf32>
    %cst_17 = arith.constant 0.166666672 : f32
    %25 = vector.broadcast %cst_17 : f32 to vector<4x1xf32>
    %26 = arith.mulf %24, %25 : vector<4x1xf32>
    %cst_18 = arith.constant 5.000000e-01 : f32
    %27 = vector.broadcast %cst_18 : f32 to vector<4x1xf32>
    %28 = arith.addf %26, %27 : vector<4x1xf32>
    %cst_19 = arith.constant 0.000000e+00 : f32
    %cst_20 = arith.constant 1.000000e+00 : f32
    %29 = vector.broadcast %cst_19 : f32 to vector<4x1xf32>
    %30 = arith.maximumf %29, %28 : vector<4x1xf32>
    %31 = vector.broadcast %cst_20 : f32 to vector<4x1xf32>
    %32 = arith.minimumf %31, %30 : vector<4x1xf32>
    %c0_21 = arith.constant 0 : index
    %c0_22 = arith.constant 0 : index
    %33 = vector.load %arg8[%c0_21, %c0_22] : memref<8x1xf32, #tpu.memory_space<vmem>>, vector<4x1xf32>
    tpu.vector_store %arg8[%c0_21, %c0_22], %32 {strides = array<i32>} : memref<8x1xf32, #tpu.memory_space<vmem>>, vector<4x1xf32>,
    %c4 = arith.constant 4 : index
    %c0_23 = arith.constant 0 : index
    %34 = vector.load %arg7[%c4, %c0_23] : memref<8x1xf32, #tpu.memory_space<vmem>>, vector<4x1xf32>
    %35 = arith.mulf %34, %9 : vector<4x1xf32>
    %cst_24 = arith.constant dense<0.000000e+00> : vector<1xf32>
    %36 = vector.multi_reduction <add>, %35, %cst_24 [0] : vector<4x1xf32> to vector<1xf32>
    %37 = vector.shape_cast %36 : vector<1xf32> to vector<1x1xf32>
    %38 = arith.addf %37, %11 : vector<1x1xf32>
    %cst_25 = arith.constant 0.000000e+00 : f32
    %39 = vector.broadcast %cst_25 : f32 to vector<1x1xf32>
    %40 = arith.maximumf %38, %39 : vector<1x1xf32>
    %41 = vector.broadcast %40 : vector<1x1xf32> to vector<4x1xf32>
    %42 = arith.mulf %41, %10 : vector<4x1xf32>
    %cst_26 = arith.constant dense<0.000000e+00> : vector<4xf32>
    %43 = vector.multi_reduction <add>, %42, %cst_26 [1] : vector<4x1xf32> to vector<4xf32>
    %44 = vector.shape_cast %43 : vector<4xf32> to vector<4x1xf32>
    %45 = arith.addf %44, %12 : vector<4x1xf32>
    %cst_27 = arith.constant 0.166666672 : f32
    %46 = vector.broadcast %cst_27 : f32 to vector<4x1xf32>
    %47 = arith.mulf %45, %46 : vector<4x1xf32>
    %cst_28 = arith.constant 5.000000e-01 : f32
    %48 = vector.broadcast %cst_28 : f32 to vector<4x1xf32>
    %49 = arith.addf %47, %48 : vector<4x1xf32>
    %cst_29 = arith.constant 0.000000e+00 : f32
    %cst_30 = arith.constant 1.000000e+00 : f32
    %50 = vector.broadcast %cst_29 : f32 to vector<4x1xf32>
    %51 = arith.maximumf %50, %49 : vector<4x1xf32>
    %52 = vector.broadcast %cst_30 : f32 to vector<4x1xf32>
    %53 = arith.minimumf %52, %51 : vector<4x1xf32>
    %c4_31 = arith.constant 4 : index
    %c0_32 = arith.constant 0 : index
    %54 = vector.load %arg8[%c4_31, %c0_32] : memref<8x1xf32, #tpu.memory_space<vmem>>, vector<4x1xf32>
    tpu.vector_store %arg8[%c4_31, %c0_32], %53 {strides = array<i32>} : memref<8x1xf32, #tpu.memory_space<vmem>>, vector<4x1xf32>,
    %c0_33 = arith.constant 0 : index
    %c0_34 = arith.constant 0 : index
    %55 = vector.load %arg8[%c0_33, %c0_34] : memref<8x1xf32, #tpu.memory_space<vmem>>, vector<8x1xf32>
    %56 = vector.broadcast %55 : vector<8x1xf32> to vector<8x256xf32>
    %57 = arith.mulf %0, %56 : vector<8x256xf32>
    %c0_35 = arith.constant 0 : index
    %c0_36 = arith.constant 0 : index
    %58 = vector.load %arg6[%c0_35, %c0_36] : memref<8x256xf32, #tpu.memory_space<vmem>>, vector<8x256xf32>
    tpu.vector_store %arg6[%c0_35, %c0_36], %57 {strides = array<i32>} : memref<8x256xf32, #tpu.memory_space<vmem>>, vector<8x256xf32>,
    return
  }
  func.func @transform_0(%arg0: i32) -> (i32, i32) {
    %c0_i32 = arith.constant 0 : i32
    %c0_i32_0 = arith.constant 0 : i32
    %c0_i32_1 = arith.constant 0 : i32
    return %c0_i32, %c0_i32_0 : i32, i32
  }
  func.func @transform_1(%arg0: i32) -> (i32, i32) {
    %c0_i32 = arith.constant 0 : i32
    %c0_i32_0 = arith.constant 0 : i32
    %c0_i32_1 = arith.constant 0 : i32
    return %c0_i32, %c0_i32_0 : i32, i32
  }
  func.func @transform_2(%arg0: i32) -> (i32, i32) {
    %c0_i32 = arith.constant 0 : i32
    %c0_i32_0 = arith.constant 0 : i32
    %c0_i32_1 = arith.constant 0 : i32
    return %c0_i32, %c0_i32_0 : i32, i32
  }
  func.func @transform_3(%arg0: i32) -> (i32, i32) {
    %c0_i32 = arith.constant 0 : i32
    %c0_i32_0 = arith.constant 0 : i32
    %c0_i32_1 = arith.constant 0 : i32
    return %c0_i32, %c0_i32_0 : i32, i32
  }
  func.func @transform_4(%arg0: i32) -> (i32, i32) {
    %c0_i32 = arith.constant 0 : i32
    %c0_i32_0 = arith.constant 0 : i32
    %c0_i32_1 = arith.constant 0 : i32
    return %c0_i32, %c0_i32_0 : i32, i32
  }
  func.func @transform_5(%arg0: i32) -> (i32, i32) {
    %c0_i32 = arith.constant 0 : i32
    %c0_i32_0 = arith.constant 0 : i32
    %c0_i32_1 = arith.constant 0 : i32
    return %c0_i32, %c0_i32_0 : i32, i32
  }
}

</mosaic_0001>

<bundles_post_ra>
// kernel: tpu_custom_call.1
= control target key start
LH: loop header
LB: loop body
LE: loop exit
PB: predicated region body
PF: predicated region fallthrough
CT: control target
= control target key end

     0   :  { %s188_s0 = inlined_call_operand.vmem [shape: f32[8,256], index: 0, kind: input, shape index: {}]   ;;  %s189_s1 = inlined_call_operand.vmem [shape: f32[4,1], index: 1, kind: input, shape index: {}]   ;;  %s190_s2 = inlined_call_operand.<no memory space> [shape: f32[1,1], index: 2, kind: input, shape index: {}]   ;;  %s191_s3 = inlined_call_operand.vmem [shape: f32[4,1], index: 3, kind: input, shape index: {}]   ;;  %s192_s4 = inlined_call_operand.vmem [shape: f32[4,1], index: 4, kind: input, shape index: {}]   ;;  %s193_s5 = inlined_call_operand.hbm [shape: f32[8,256], index: 5, kind: output, shape index: {}]  }
   0x1   :  { %v10_v0 = vstv %s190_s2 }
   0x2   :  { %11 = vst [vmem:[#allocation4] sm:$0x1] %v10_v0 }
   0x3   :  { %v23_v1 = vld [vmem:[%s188_s0] sm:$0xff]  ;;  %v24_v2 = vld [vmem:[%s188_s0 + $0x8] sm:$0xff] }
   0x4   :  { %v25_v3 = vadd.f32 %v24_v2, %v23_v1 }
   0x5   :  { %12 = vsyncpa [#allocation6], 0  ;;  %v131_v4 = vmov 0   ;;  %vm29_vm0 = vcmask 7168   ;;  %v31_v7 = vld [vmem:[%s189_s1] sm:$0xf] }
   0x6   :  { %26 = vadd.xlane.f32.xlu0 %v25_v3  ;;  %vm37_vm1 = vcmask 3072   ;;  %v32_v31 = vld [vmem:[%s191_s3] sm:$0xf]  ;;  %s132_s3 = smov [#allocation5]   ;;  %s93_s29 = sshll.u32 %s193_s5, 4  ;;  %s94_s29 = int_to_ptr.hbm [resolvable:$true] %s93_s29 }
   0x7   :  { %104 = vset.pattern.permute.xlu0 %v131_v4  ;;  %v34_v34 = vld [vmem:[%s192_s4] sm:$0xf]  ;;  %s91_s4 = sshll.u32 %s132_s3, 4  ;;  %s92_s4 = int_to_ptr.vmem [resolvable:$true] %s91_s4 }
   0x9   :  { %v33_v24 = vld [vmem:[#allocation4] sm:$0x1] }
  0x79   :  { %v27_v5 = vpop.xlane.xlu0 %26 }
  0x7a   :  { %v28_v6 = vmul.f32 0.00390625, %v27_v5 }
  0x7c   :  { %30 = vst.msk [vmem:[#allocation2] sm:$0xff] %vm29_vm0, %v28_v6 }
  0x83   :  { %v35_v8 = vld [vmem:[#allocation2] sm:$0xf]  ;;  %v56_v9 = vld [vmem:[#allocation2 + $0x4] sm:$0xf] }
  0x84   :  { %v36_v10 = vmul.f32 %v35_v8, %v31_v7  ;;  %v57_v11 = vmul.f32 %v56_v9, %v31_v7 }
  0x86   :  { %v38_v12 = vsel %vm37_vm1, %v36_v10, 0.0  ;;  %v58_v13 = vsel %vm37_vm1, %v57_v11, 0.0 }
  0x87   :  { %v39_v14 = vrot.slane %v38_v12, 4  ;;  %v59_v15 = vrot.slane %v58_v13, 4 }
  0x89   :  { %v40_v16 = vadd.f32 %v39_v14, %v38_v12  ;;  %v60_v17 = vadd.f32 %v59_v15, %v58_v13 }
  0x8b   :  { %v41_v18 = vrot.slane %v40_v16, 2  ;;  %v61_v19 = vrot.slane %v60_v17, 2 }
  0x8d   :  { %v42_v20 = vadd.f32 %v41_v18, %v40_v16  ;;  %v62_v21 = vadd.f32 %v61_v19, %v60_v17 }
  0x8f   :  { %v43_v22 = vrot.slane %v42_v20, 1  ;;  %v63_v23 = vrot.slane %v62_v21, 1 }
  0x91   :  { %v44_v25 = vadd.f32 %v43_v22, %v42_v20  ;;  %v64_v26 = vadd.f32 %v63_v23, %v62_v21 }
  0x93   :  { %v45_v27 = vadd.f32 %v44_v25, %v33_v24  ;;  %v65_v28 = vadd.f32 %v64_v26, %v33_v24 }
  0x95   :  { %v46_v29 = vmax.f32 %v45_v27, 0.0  ;;  %v66_v30 = vmax.f32 %v65_v28, 0.0 }
  0x97   :  { %v47_v32 = vperm.slane %v46_v29, 0  ;;  %v67_v33 = vperm.slane %v66_v30, 0 }
  0x99   :  { %v48_v35 = vmul.f32 %v47_v32, %v32_v31  ;;  %v68_v36 = vmul.f32 %v67_v33, %v32_v31 }
  0x9b   :  { %v50_v37 = vadd.f32 %v48_v35, %v34_v34  ;;  %v70_v38 = vadd.f32 %v68_v36, %v34_v34 }
  0x9d   :  { %v51_v39 = vmul.f32 0.16666667, %v50_v37  ;;  %v71_v40 = vmul.f32 0.16666667, %v70_v38 }
  0x9f   :  { %v52_v41 = vadd.f32 0.5, %v51_v39  ;;  %v72_v42 = vadd.f32 0.5, %v71_v40 }
  0xa1   :  { %v53_v43 = vmax.f32 %v52_v41, 0.0  ;;  %v73_v44 = vmax.f32 %v72_v42, 0.0 }
  0xa3   :  { %v54_v45 = vmin.f32 %v53_v43, 1.0  ;;  %v74_v46 = vmin.f32 %v73_v44, 1.0 }
  0xa5   :  { %55 = vst.msk [vmem:[#allocation3] sm:$0xf] %vm37_vm1, %v54_v45 }
  0xa6   :  { %75 = vst.msk [vmem:[#allocation3 + $0x4] sm:$0xf] %vm37_vm1, %v74_v46 }
  0xad   :  { %v76_v47 = vld [vmem:[#allocation3] sm:$0xff] }
  0xae   :  { %79 = vperm.xlu0 %104, %v76_v47  }
 0x120   :  { %v80_v48 = vpop.permute.xlu0 %79 }
 0x121   :  { %v82_v49 = vmul.f32 %v80_v48, %v23_v1  ;;  %v83_v50 = vmul.f32 %v80_v48, %v24_v2 }
 0x123   :  { %84 = vst [vmem:[#allocation5] sm:$0xff] %v82_v49 }
 0x124   :  { %85 = vst [vmem:[#allocation5 + $0x8] sm:$0xff] %v83_v50 }
 0x125   :  { %96 = dma.vmem_to_hbm [thread:$0]  %s92_s4, 256, %s94_s29, [#allocation6]  }
 0x126   :  { %129 = dma.done.wait [#allocation6], 256  }
 0x127   :  { %130 = vsyncadd [#allocation6], 4294967040 }
 0x128   :  { %101 = vsyncpa [#allocation6], 1 }

</bundles_post_ra>
